<compile_context>
chip_gen: v6e
topology: v6e:2x2x1
jax: 0.10.0
libtpu: 0.0.40
codegen_flags: <defaults>
</compile_context>

<pallas_src>
import jax
import jax.numpy as jnp
from jax.experimental import pallas as pl
from jax.experimental.pallas import tpu as pltpu

HORSES_PER_RACE = 14


def _seq_embed_kernel(seq_ref, out_ref):
    # seq_ref: (rows_tile, F) VMEM tile ; out_ref: (rows_tile, 14 + F - 1)
    seq = seq_ref[...]                                   # (rows, F)
    rows = seq.shape[0]

    horse = seq[:, 0:1]                                  # (rows, 1) float id
    # Slots 1..14 as floats; horse == slot builds the one-hot row directly.
    # horse == 0 (no horse) and out-of-range ids give an all-zero row, which
    # matches the reference semantics — no cast / mask / select needed.
    slots = jax.lax.broadcasted_iota(jnp.int32, (rows, HORSES_PER_RACE), 1) + 1
    onehot = (horse == slots.astype(seq.dtype)).astype(out_ref.dtype)

    # Two slice stores instead of a lane-axis concatenate at offset 14.
    out_ref[:, :HORSES_PER_RACE] = onehot                # (rows, 14)
    out_ref[:, HORSES_PER_RACE:] = seq[:, 1:]            # (rows, F - 1)


def _choose_row_tile(rows: int) -> int:
    """Pick a sublane-aligned row tile (~1024 rows) with >= 2 grid steps."""
    if rows <= 8:
        return rows                       # single block equal to full extent
    tile = min(1024, (rows // 8) * 8)     # multiple of 8 (sublane aligned)
    if pl.cdiv(rows, tile) < 2:
        # Keep at least two grid steps so the parallel axis can shard across
        # both TensorCores on v7x-class chips.
        tile = max(8, ((rows // 2) // 8) * 8)
    return tile


def sequence_embedding(seq: jax.Array) -> jax.Array:
    """Pallas implementation of SequenceEmbedding.forward."""
    b, s, f = seq.shape
    out_f = HORSES_PER_RACE + (f - 1)

    rows = b * s
    seq2 = seq.reshape(rows, f)           # leading-dim reshape: no data movement
    row_tile = _choose_row_tile(rows)
    grid = (pl.cdiv(rows, row_tile),)

    out2 = pl.pallas_call(
        _seq_embed_kernel,
        out_shape=jax.ShapeDtypeStruct((rows, out_f), seq.dtype),
        grid_spec=pltpu.PrefetchScalarGridSpec(
            num_scalar_prefetch=0,
            grid=grid,
            in_specs=[pl.BlockSpec((row_tile, f), lambda i: (i, 0))],
            out_specs=pl.BlockSpec((row_tile, out_f), lambda i: (i, 0)),
        ),
        compiler_params=pltpu.CompilerParams(
            dimension_semantics=("parallel",),
            # Tiles here cost at most a few MiB even with lane padding
            # (F, out_f pad to 128 lanes); 32 MiB is safe on every generation
            # including v7x's 64 MiB physical VMEM.
            vmem_limit_bytes=32 * 1024 * 1024,
        ),
    )(seq2)

    return out2.reshape(b, s, out_f)


def _reference(seq: jax.Array) -> jax.Array:
    """Pure-JAX reference mirroring the PyTorch forward."""
    horse = seq[..., 0]
    onehot = jax.nn.one_hot(horse.astype(jnp.int32) - 1, HORSES_PER_RACE,
                            dtype=seq.dtype)
    onehot = jnp.where((horse != 0)[..., None], onehot,
                       jnp.zeros_like(onehot))
    return jnp.concatenate([onehot, seq[..., 1:]], axis=-1)


if __name__ == "__main__":
    key = jax.random.PRNGKey(0)
    k_horse, k_feat = jax.random.split(key)

    B, S, F = 2, 8, 5  # batch=2, sequence=8, features=5 (horse id + 4 extras)

    horse_ids = jax.random.randint(k_horse, (B, S, 1), 0, HORSES_PER_RACE + 1)
    extras = jax.random.normal(k_feat, (B, S, F - 1), dtype=jnp.float32)
    seq = jnp.concatenate([horse_ids.astype(jnp.float32), extras], axis=-1)

    out = sequence_embedding(seq)
    jax.block_until_ready(out)

    ref = _reference(seq)
    assert out.shape == (B, S, HORSES_PER_RACE + F - 1)
    assert jnp.allclose(out, ref, atol=1e-6), "mismatch vs reference"

    print("KERNEL_OK")
</pallas_src>

<mosaic_0001>
module attributes {stable_mosaic.version = 11 : i64} {
  func.func @_seq_embed_kernel(%arg0: i32, %arg1: memref<8x5xf32, #tpu.memory_space<vmem>>, %arg2: memref<8x18xf32, #tpu.memory_space<vmem>>) attributes {dimension_semantics = [#tpu.dimension_semantics<parallel>], iteration_bounds = array<i64: 2>, scalar_prefetch = 0 : i64, scratch_operands = 0 : i64, tpu.core_type = #tpu.core_type<tc>, window_params = [{transform_indices = @transform_0, window_bounds = array<i64: 8, 5>}, {transform_indices = @transform_1, window_bounds = array<i64: 8, 18>}]} {
    %c0 = arith.constant 0 : index
    %c0_0 = arith.constant 0 : index
    %0 = vector.load %arg1[%c0, %c0_0] : memref<8x5xf32, #tpu.memory_space<vmem>>, vector<8x5xf32>
    %1 = vector.extract_strided_slice %0 {offsets = [0, 0], sizes = [8, 1], strides = [1, 1]} : vector<8x5xf32> to vector<8x1xf32>
    %2 = tpu.iota {dimensions = array<i32: 1>} : vector<8x14xi32>
    %c1_i32 = arith.constant 1 : i32
    %3 = vector.broadcast %c1_i32 : i32 to vector<8x14xi32>
    %4 = arith.addi %2, %3 : vector<8x14xi32>
    %5 = arith.sitofp %4 : vector<8x14xi32> to vector<8x14xf32>
    %6 = vector.broadcast %1 : vector<8x1xf32> to vector<8x14xf32>
    %7 = arith.cmpf oeq, %6, %5 : vector<8x14xf32>
    %8 = arith.extui %7 : vector<8x14xi1> to vector<8x14xi32>
    %9 = arith.sitofp %8 : vector<8x14xi32> to vector<8x14xf32>
    %c0_1 = arith.constant 0 : index
    %c0_2 = arith.constant 0 : index
    %10 = vector.load %arg2[%c0_1, %c0_2] : memref<8x18xf32, #tpu.memory_space<vmem>>, vector<8x14xf32>
    tpu.vector_store %arg2[%c0_1, %c0_2], %9 {strides = array<i32>} : memref<8x18xf32, #tpu.memory_space<vmem>>, vector<8x14xf32>,
    %11 = vector.extract_strided_slice %0 {offsets = [0, 1], sizes = [8, 4], strides = [1, 1]} : vector<8x5xf32> to vector<8x4xf32>
    %c0_3 = arith.constant 0 : index
    %c14 = arith.constant 14 : index
    %12 = vector.load %arg2[%c0_3, %c14] : memref<8x18xf32, #tpu.memory_space<vmem>>, vector<8x4xf32>
    tpu.vector_store %arg2[%c0_3, %c14], %11 {strides = array<i32>} : memref<8x18xf32, #tpu.memory_space<vmem>>, vector<8x4xf32>,
    return
  }
  func.func @transform_0(%arg0: i32) -> (i32, i32) {
    %c0_i32 = arith.constant 0 : i32
    %c0_i32_0 = arith.constant 0 : i32
    return %arg0, %c0_i32 : i32, i32
  }
  func.func @transform_1(%arg0: i32) -> (i32, i32) {
    %c0_i32 = arith.constant 0 : i32
    %c0_i32_0 = arith.constant 0 : i32
    return %arg0, %c0_i32 : i32, i32
  }
}

</mosaic_0001>

<bundles_post_ra>
// kernel: tpu_custom_call.1
= control target key start
LH: loop header
LB: loop body
LE: loop exit
PB: predicated region body
PF: predicated region fallthrough
CT: control target
= control target key end

     0   :  { %6 = vsyncpa [#allocation3], 0  ;;  %s428_s0 = inlined_call_operand.vmem [shape: f32[16,5], index: 0, kind: input, shape index: {}]   ;;  %s429_s1 = inlined_call_operand.hbm [shape: f32[16,18], index: 1, kind: output, shape index: {}]  }
   0x1   :  { %8 = vsyncpa [#allocation3 + $0x1], 0  ;;  %s335_s6 = smov 0   ;;  %s337_s7 = smov 0  }
   0x2   :  { %s339_s8 = smov 0   ;;  %s341_s9 = smov 0  }
   0x3 LB: > { %s356_s10 = sadd.s32 4294967295, %s319_s9   ;;  %s205_s11 = sadd.s32 4294967294, %s319_s9   ;;  %s319_s9 = sphi %s341_s9, %s435_s9   ;;  %s315_s8 = sphi %s339_s8, %s434_s8   ;;  %s311_s7 = sphi %s337_s7, %s433_s7   ;;  %s307_s6 = sphi %s335_s6, %s432_s6  }
   0x4   : > { %s360_s12 = sadd.s32 1, %s319_s9   ;;  %s47_s13 = sadd.s32 1, %s315_s8 }
   0x5   : > { %s44_s14 = ssub.s32 %s319_s9, %s360_s12  ;;  %p57_p0 = scmp.ne.s32.totalorder %s315_s8, %s311_s7 }
   0x6   : > { %p45_p1 = scmp.eq.s32.totalorder %s44_s14, 0  ;;  %p58_p2 = scmp.eq.s32.totalorder %s356_s10, 1 }
   0x7   : > { %p63_p3 = scmp.ne.s32.totalorder %s311_s7, %s307_s6  ;;  %p64_p4 = scmp.eq.s32.totalorder %s205_s11, 1 }
   0x8   : > { %s371_s15 = scalar_select %p45_p1, %s315_s8, %s47_s13  }
   0x9   : > { %p373_p5 = por %p58_p2, %p57_p0  ;;  %p377_p6 = por %p64_p4, %p63_p3 }
   0xa   : > { %p208_p7 = scmp.ge.s32.totalorder %s319_s9, 1  ;;  %p89_p8 = scmp.lt.s32.totalorder %s319_s9, 3 }
   0xc   : > { %p90_p9 = pnand %p208_p7, %p89_p8 }
   0xd   : > { %p108_p10 = scmp.lt.s32.totalorder (!%p90_p9), %s356_s10, 1  ;;  %s322_s23 = smov (!%p90_p9), 13  }
   0xe   : > { %93 = sbr.rel (%p90_p9) target bundleno = 165 (0xa5), region = 24  ;;  %s105_s24 = sand.u32 (!%p90_p9), 1, %s311_s7  }
   0xf   : > { %s209_s25 = sshll.u32 (!%p90_p9), %s105_s24, 3  ;;  %s213_s26 = sshll.u32 (!%p90_p9), %s356_s10, 7 }
  0x10   : > { %s107_s27 = scalar_lea.vmem (!%p90_p9), [#allocation2], %s209_s25  ;;  %s393_s2 = scalar_lea.hbm (!%p90_p9), %s429_s1, %s213_s26 }
  0x11   : > { %s146_s28 = sshll.u32 (!%p90_p9), %s107_s27, 4  ;;  %s133_s3 = scalar_lea.sflag (!%p90_p9), [#allocation3], %s105_s24  ;;  %s147_s28 = int_to_ptr.vmem [resolvable:$true] %s146_s28 }
  0x12   : > { %s259_s4 = scalar_lea.vmem (!%p90_p9), %s147_s28, 128  ;;  %s324_s5 = smov (!%p90_p9), [#allocation2]  }
  0x13   : > { %v321_v0 = vmov 0   ;;  %s109_s18 = scalar_select %p108_p10, %s356_s10, 1  ;;  %v113_v2 = vlaneseq  ;;  %vm125_vm0 = vcmask 113664   ;;  %v323_v7 = vmov 0.0  }
  0x14   : > { %258 = vset.pattern.permute.xlu0 %v321_v0  ;;  %vm130_vm2 = vcmask 146544   ;;  %p260_p11 = scmp.ne.s32.totalorder %s147_s28, %s259_s4  ;;  %s263_s10 = sshll.u32 %s324_s5, 4  ;;  %s264_s10 = int_to_ptr.vmem [resolvable:$false] %s263_s10 }
  0x15   : > { %s210_s19 = sshll.u32 %s109_s18, 3  ;;  %v114_v3 = vand.u32 127, %v113_v2  ;;  %s265_s11 = scalar_lea.vmem %s264_s10, 256 }
  0x16   : > { %s111_s22 = scalar_lea.vmem %s428_s0, %s210_s19  ;;  %p261_p12 = pnand %p260_p11, %p373_p5 }
  0x17   : > { %v112_v1 = vld [vmem:[%s111_s22] sm:$0xff]  ;;  %v115_v4 = vadd.s32 1, %v114_v3  ;;  %p266_p0 = scmp.lt.s32.totalorder %s147_s28, %s264_s10  ;;  %p267_p1 = scmp.lt.s32.totalorder %s265_s11, %s259_s4 }
  0x18   : > { %119 = vperm.xlu0 %258, %v112_v1   ;;  %p262_p13 = pneg %p261_p12 }
  0x19   : > { %v116_v5 = vcvt.s32.f32 %v115_v4  ;;  %p268_p2 = por %p267_p1, %p266_p0 }
  0x1b   : > { %p269_p3 = pnand %p268_p2, %p262_p13 }
  0x1c   : > { %127 = vrot.lane.b32.xlu0 %v112_v1, %s322_s23 }
  0x93   : > { %v120_v6 = vpop.permute.xlu0 %119 }
  0x94   : > { %vm122_vm1 = vcmp.eq.f32.partialorder %v120_v6, %v116_v5 }
  0x95   : > { %v211_v8 = vsel %vm122_vm1, 1.0, %v323_v7 }
  0x96   : > { %126 = vst.msk [vmem:[%s107_s27] sm:$0xff] %vm125_vm0, %v211_v8 }
  0x97   : > { %v128_v9 = vpop.permute.xlu0 %127 }
  0x98   : > { %131 = vst.msk [vmem:[%s107_s27] sm:$0xff] %vm130_vm2, %v128_v9 }
  0x99   : > { %272 = shalt.err (!%p269_p3)
}
  0x9a   : > { %s273_s13 = scalar_lea.hbm %s393_s2, 128  ;;  %s277_s19 = scalar_lea.hbm %s429_s1, 256 }
  0x9b   : > { %p274_p4 = scmp.ne.s32.totalorder %s393_s2, %s273_s13  ;;  %p278_p9 = scmp.lt.s32.totalorder %s393_s2, %s429_s1 }
  0x9c   : > { %p279_p10 = scmp.lt.s32.totalorder %s277_s19, %s273_s13 }
  0x9d   : > { %p275_p7 = pnand %p274_p4, %p373_p5 }
  0x9e   : > { %p280_p11 = por %p279_p10, %p278_p9 }
  0x9f   : > { %p276_p8 = pneg %p275_p7 }
  0xa1   : > { %p281_p12 = pnand %p280_p11, %p276_p8 }
  0xa3   : > { %284 = shalt.err (!%p281_p12)
}
  0xa4   : > { %216 = dma.vmem_to_hbm [thread:$0]  (%p373_p5), %s147_s28, 128, %s393_s2, %s133_s3  }
  0xa5 PF: > { %p222_p13 = scmp.ge.s32.totalorder %s319_s9, 2  ;;  %s158_s22 = sand.u32 1, %s307_s6  }
  0xa6   : > { %s159_s23 = scalar_lea.sflag [#allocation3], %s158_s22 }
  0xa7   : > { %p219_p0 = pnand %p222_p13, %p377_p6 }
  0xa9   : > { %p220_p1 = pneg %p219_p0 }
  0xab   : > { %302 = dma.done.wait (%p220_p1), %s159_s23, 128  }
  0xac   : > { %304 = vsyncadd (%p220_p1), %s159_s23, 4294967168  ;;  %p11_p2 = scmp.ge.s32.totalorder %s360_s12, 4   ;;  %s432_s6 = smov %s311_s7 }
  0xad   : > { %s433_s7 = smov %s315_s8  ;;  %s434_s8 = smov %s371_s15 }
  0xae   : > { %s435_s9 = smov %s360_s12  ;;  %13 = sbr.rel (!%p11_p2) target bundleno = 3 (0x3), region = 59 }
  0xb3   :  { %164 = vsyncpa [#allocation3], 1 }
  0xb4   :  { %166 = vsyncpa [#allocation3 + $0x1], 1 }

</bundles_post_ra>
